<compile_context>
chip_gen: v7x
topology: tpu7x:2x2x1
jax: 0.10.0
libtpu: 0.0.40
codegen_flags: <defaults>
</compile_context>

<pallas_src>
import math

import jax
import jax.numpy as jnp
from jax import lax
from jax.experimental import pallas as pl
from jax.experimental.pallas import tpu as pltpu

KSIZE = 7
PAD = 3                         # padding = 3 for kernel_size 7 (as in the PyTorch module)
_VMEM_LIMIT = 32 * 1024 * 1024  # >= every generation's scoped default; blocks stay small anyway


# ---------------------------------------------------------------------------
# Wrapper-side precomputation: fold the 7x7 conv into MXU-friendly matrices.
# ---------------------------------------------------------------------------
def _build_conv_matrices(weight, H, W):
    """Returns (bm, bx, sm):
       bm, bx : (7, W, W) band matrices (mean plane / max plane), one per kh tap row;
                B[kh][w_in, w_out] = weight[ci, kh, w_in - w_out + PAD] inside the band,
                zero outside -> folds the kw taps *and* the W zero-padding.
       sm     : (7, H, H) row-shift matrices; S[kh][h_out, r] = 1 iff r == h_out + kh - PAD,
                which folds the kh offset *and* the H zero-padding.
       conv(mean, max) == sum_kh sm[kh] @ (mean @ bm[kh] + max @ bx[kh])
    """
    wt = weight.reshape(2, KSIZE, KSIZE).astype(jnp.float32)
    w_in = jnp.arange(W)[:, None]
    w_out = jnp.arange(W)[None, :]
    kw = w_in - w_out + PAD                                    # (W, W)
    valid = (kw >= 0) & (kw < KSIZE)
    kw_safe = jnp.clip(kw, 0, KSIZE - 1)
    bands = jnp.where(valid[None, None], wt[:, :, kw_safe], 0.0)   # (2, 7, W, W)

    h_out = jnp.arange(H)[None, :, None]
    r = jnp.arange(H)[None, None, :]
    kh = jnp.arange(KSIZE)[:, None, None]
    sm = (r == h_out + kh - PAD).astype(jnp.float32)               # (7, H, H)
    return bands[0], bands[1], sm


# ---------------------------------------------------------------------------
# Kernel A: channel mean/max reduction + MXU conv + sigmoid -> (B, H, W) map.
# ---------------------------------------------------------------------------
def _make_attn_kernel(c_total, c_chunk):
    inv_c = 1.0 / float(c_total)

    def kernel(x_ref, bm_ref, bx_ref, sm_ref, attn_ref, sum_ref, max_ref):
        # x_ref:    (c_chunk, H, W)   current channel chunk of one batch element
        # bm/bx:    (7, W, W) band matrices;  sm_ref: (7, H, H) shift matrices
        # attn_ref: (H, W) f32 output, resident across the C grid axis
        # sum/max:  (H, W) f32 scratch accumulators
        c = pl.program_id(1)
        H, W = sum_ref.shape

        @pl.when(c == 0)
        def _():
            sum_ref[...] = jnp.zeros((H, W), jnp.float32)
            max_ref[...] = jnp.full((H, W), -jnp.inf, jnp.float32)

        def body(i, carry):
            s, m = carry
            xi = x_ref[i].astype(jnp.float32)          # one (H, W) plane at a time
            return s + xi, jnp.maximum(m, xi)

        s, m = lax.fori_loop(0, c_chunk, body,
                             (sum_ref[...], max_ref[...]), unroll=True)
        sum_ref[...] = s
        max_ref[...] = m

        @pl.when(c == pl.num_programs(1) - 1)
        def _():
            mean = sum_ref[...] * inv_c
            mx = max_ref[...]
            acc = jnp.zeros((H, W), jnp.float32)
            for kh in range(KSIZE):                    # 21 MXU matmuls, fully unrolled
                mk = jnp.dot(mean, bm_ref[kh], preferred_element_type=jnp.float32)
                mk = mk + jnp.dot(mx, bx_ref[kh], preferred_element_type=jnp.float32)
                acc = acc + jnp.dot(sm_ref[kh], mk, preferred_element_type=jnp.float32)
            attn_ref[...] = jax.nn.sigmoid(acc)

    return kernel


# ---------------------------------------------------------------------------
# Kernel B: lane-dense elementwise apply  out = x * attn  on (C_chunk, H*W) blocks.
# ---------------------------------------------------------------------------
def _apply_kernel(x_ref, attn_ref, o_ref):
    a = attn_ref[...]                                   # (1, H*W) f32
    o_ref[...] = (x_ref[...].astype(jnp.float32) * a).astype(o_ref.dtype)


# ---------------------------------------------------------------------------
# Chunk selection (keeps per-step VMEM blocks small enough for v7x's 64 MiB).
# ---------------------------------------------------------------------------
def _reduce_chunk(C, plane_bytes, max_chunk=8, budget_bytes=1 << 20):
    best = 1
    for d in range(1, min(C, max_chunk) + 1):
        if C % d == 0 and d * plane_bytes <= budget_bytes:
            best = d
    return best


def _apply_chunk(C, row_bytes, budget_bytes=2 << 20):
    if C * row_bytes <= budget_bytes:
        return C                                        # full-C block is always legal
    best = None
    for d in range(8, C, 8):                            # multiples of 8 keep sublane tiling legal
        if C % d == 0 and d * row_bytes <= budget_bytes:
            best = d
    # Fallback: whole C (only reachable when C has no multiple-of-8 divisor under budget).
    return best if best is not None else C


# ---------------------------------------------------------------------------
# Public wrapper.
# ---------------------------------------------------------------------------
def spatial_attention(x, weight):
    """x: (B, C, H, W); weight: (1, 2, 7, 7) conv weight (no bias). Returns x * sigmoid(conv)."""
    B, C, H, W = x.shape
    bm, bx, sm = _build_conv_matrices(weight, H, W)
    itemsize = jnp.dtype(x.dtype).itemsize

    # ---- Kernel A: attention map (B, H, W), C as an "arbitrary" reduction grid axis.
    cca = _reduce_chunk(C, H * W * itemsize)
    attn = pl.pallas_call(
        _make_attn_kernel(C, cca),
        out_shape=jax.ShapeDtypeStruct((B, H, W), jnp.float32),
        grid_spec=pltpu.PrefetchScalarGridSpec(
            num_scalar_prefetch=0,
            grid=(B, C // cca),
            in_specs=[
                pl.BlockSpec((pl.Squeezed(), cca, H, W), lambda b, c: (b, c, 0, 0)),
                pl.BlockSpec((KSIZE, W, W), lambda b, c: (0, 0, 0)),
                pl.BlockSpec((KSIZE, W, W), lambda b, c: (0, 0, 0)),
                pl.BlockSpec((KSIZE, H, H), lambda b, c: (0, 0, 0)),
            ],
            out_specs=pl.BlockSpec((pl.Squeezed(), H, W), lambda b, c: (b, 0, 0)),
            scratch_shapes=[pltpu.VMEM((H, W), jnp.float32),
                            pltpu.VMEM((H, W), jnp.float32)],
        ),
        compiler_params=pltpu.CompilerParams(
            dimension_semantics=("parallel", "arbitrary"),
            vmem_limit_bytes=_VMEM_LIMIT),
    )(x, bm, bx, sm)

    # ---- Kernel B: lane-dense apply on x viewed as (B, C, H*W).
    HW = H * W
    x2 = x.reshape(B, C, HW)          # free (contiguous) reshape in the wrapper
    a2 = attn.reshape(B, 1, HW)
    ccb = _apply_chunk(C, HW * itemsize)
    out2 = pl.pallas_call(
        _apply_kernel,
        out_shape=jax.ShapeDtypeStruct((B, C, HW), x.dtype),
        grid_spec=pltpu.PrefetchScalarGridSpec(
            num_scalar_prefetch=0,
            grid=(B, C // ccb),
            in_specs=[
                pl.BlockSpec((pl.Squeezed(), ccb, HW), lambda b, c: (b, c, 0)),
                pl.BlockSpec((pl.Squeezed(), 1, HW), lambda b, c: (b, 0, 0)),
            ],
            out_specs=pl.BlockSpec((pl.Squeezed(), ccb, HW), lambda b, c: (b, c, 0)),
        ),
        compiler_params=pltpu.CompilerParams(
            dimension_semantics=("parallel", "parallel"),
            vmem_limit_bytes=_VMEM_LIMIT),
    )(x2, a2)
    return out2.reshape(B, C, H, W)


# ---------------------------------------------------------------------------
# Pure-JAX reference mirroring the PyTorch forward.
# ---------------------------------------------------------------------------
def spatial_attention_ref(x, weight):
    ch_mean = jnp.mean(x, axis=1, keepdims=True)
    ch_max = jnp.max(x, axis=1, keepdims=True)
    cat = jnp.concatenate([ch_mean, ch_max], axis=1)
    conv = lax.conv_general_dilated(
        cat, weight, window_strides=(1, 1),
        padding=[(PAD, PAD), (PAD, PAD)],
        dimension_numbers=("NCHW", "OIHW", "NCHW"))
    return x * jax.nn.sigmoid(conv)


if __name__ == "__main__":
    key = jax.random.PRNGKey(0)
    kx, kw = jax.random.split(key)

    B, C, H, W = 2, 4, 16, 16
    x = jax.random.normal(kx, (B, C, H, W), dtype=jnp.float32)

    # Deterministic init matching nn.Conv2d default: U(-sqrt(k), sqrt(k)), k = 1/(2*49).
    bound = math.sqrt(1.0 / (2 * KSIZE * KSIZE))
    weight = jax.random.uniform(kw, (1, 2, KSIZE, KSIZE),
                                minval=-bound, maxval=bound, dtype=jnp.float32)

    out = jax.block_until_ready(spatial_attention(x, weight))
    ref = spatial_attention_ref(x, weight)

    assert out.shape == (B, C, H, W)
    # MXU f32 matmuls use bf16 passes at default precision, so allow small numeric slack
    # vs the XLA conv reference; a structural error would show up as O(0.1+) differences.
    assert jnp.allclose(out, ref, atol=2e-2, rtol=1e-2), "mismatch vs reference"

    print("KERNEL_OK")
</pallas_src>

<mosaic_0001>
module attributes {stable_mosaic.version = 11 : i64} {
  func.func @kernel(%arg0: i32, %arg1: i32, %arg2: memref<1x4x16x16xf32, #tpu.memory_space<vmem>>, %arg3: memref<7x16x16xf32, #tpu.memory_space<vmem>>, %arg4: memref<7x16x16xf32, #tpu.memory_space<vmem>>, %arg5: memref<7x16x16xf32, #tpu.memory_space<vmem>>, %arg6: memref<1x16x16xf32, #tpu.memory_space<vmem>>, %arg7: memref<16x16xf32, #tpu.memory_space<vmem>>, %arg8: memref<16x16xf32, #tpu.memory_space<vmem>>) attributes {dimension_semantics = [#tpu.dimension_semantics<parallel>, #tpu.dimension_semantics<arbitrary>], iteration_bounds = array<i64: 2, 1>, scalar_prefetch = 0 : i64, scratch_operands = 2 : i64, tpu.core_type = #tpu.core_type<tc>, window_params = [{transform_indices = @transform_0, window_bounds = array<i64: 1, 4, 16, 16>}, {pipeline_mode = #tpu.pipeline_mode<synchronous>, transform_indices = @transform_1, window_bounds = array<i64: 7, 16, 16>}, {pipeline_mode = #tpu.pipeline_mode<synchronous>, transform_indices = @transform_2, window_bounds = array<i64: 7, 16, 16>}, {pipeline_mode = #tpu.pipeline_mode<synchronous>, transform_indices = @transform_3, window_bounds = array<i64: 7, 16, 16>}, {transform_indices = @transform_4, window_bounds = array<i64: 1, 16, 16>}]} {
    %c0_i32 = arith.constant 0 : i32
    %0 = arith.cmpi eq, %arg1, %c0_i32 : i32
    %1 = arith.extui %0 : i1 to i32
    %c0_i32_0 = arith.constant 0 : i32
    %2 = arith.cmpi ne, %1, %c0_i32_0 : i32
    scf.if %2 {
      %cst = arith.constant 0.000000e+00 : f32
      %30 = vector.broadcast %cst : f32 to vector<16x16xf32>
      %c0_23 = arith.constant 0 : index
      %c0_24 = arith.constant 0 : index
      %31 = vector.load %arg7[%c0_23, %c0_24] : memref<16x16xf32, #tpu.memory_space<vmem>>, vector<16x16xf32>
      tpu.vector_store %arg7[%c0_23, %c0_24], %30 {strides = array<i32>} : memref<16x16xf32, #tpu.memory_space<vmem>>, vector<16x16xf32>,
      %cst_25 = arith.constant 0xFF800000 : f32
      %32 = vector.broadcast %cst_25 : f32 to vector<16x16xf32>
      %c0_26 = arith.constant 0 : index
      %c0_27 = arith.constant 0 : index
      %33 = vector.load %arg8[%c0_26, %c0_27] : memref<16x16xf32, #tpu.memory_space<vmem>>, vector<16x16xf32>
      tpu.vector_store %arg8[%c0_26, %c0_27], %32 {strides = array<i32>} : memref<16x16xf32, #tpu.memory_space<vmem>>, vector<16x16xf32>,
    } else {
    }
    %c0 = arith.constant 0 : index
    %c0_1 = arith.constant 0 : index
    %3 = vector.load %arg7[%c0, %c0_1] : memref<16x16xf32, #tpu.memory_space<vmem>>, vector<16x16xf32>
    %c0_2 = arith.constant 0 : index
    %c0_3 = arith.constant 0 : index
    %4 = vector.load %arg8[%c0_2, %c0_3] : memref<16x16xf32, #tpu.memory_space<vmem>>, vector<16x16xf32>
    %c0_i32_4 = arith.constant 0 : i32
    %c0_5 = arith.constant 0 : index
    %5 = arith.index_cast %c0_i32_4 : i32 to index
    %c0_6 = arith.constant 0 : index
    %c0_7 = arith.constant 0 : index
    %6 = vector.load %arg2[%c0_5, %5, %c0_6, %c0_7] : memref<1x4x16x16xf32, #tpu.memory_space<vmem>>, vector<1x1x16x16xf32>
    %7 = vector.shape_cast %6 : vector<1x1x16x16xf32> to vector<16x16xf32>
    %8 = arith.addf %3, %7 : vector<16x16xf32>
    %9 = arith.maximumf %4, %7 : vector<16x16xf32>
    %c1_i32 = arith.constant 1 : i32
    %c0_8 = arith.constant 0 : index
    %10 = arith.index_cast %c1_i32 : i32 to index
    %c0_9 = arith.constant 0 : index
    %c0_10 = arith.constant 0 : index
    %11 = vector.load %arg2[%c0_8, %10, %c0_9, %c0_10] : memref<1x4x16x16xf32, #tpu.memory_space<vmem>>, vector<1x1x16x16xf32>
    %12 = vector.shape_cast %11 : vector<1x1x16x16xf32> to vector<16x16xf32>
    %13 = arith.addf %8, %12 : vector<16x16xf32>
    %14 = arith.maximumf %9, %12 : vector<16x16xf32>
    %c2_i32 = arith.constant 2 : i32
    %c0_11 = arith.constant 0 : index
    %15 = arith.index_cast %c2_i32 : i32 to index
    %c0_12 = arith.constant 0 : index
    %c0_13 = arith.constant 0 : index
    %16 = vector.load %arg2[%c0_11, %15, %c0_12, %c0_13] : memref<1x4x16x16xf32, #tpu.memory_space<vmem>>, vector<1x1x16x16xf32>
    %17 = vector.shape_cast %16 : vector<1x1x16x16xf32> to vector<16x16xf32>
    %18 = arith.addf %13, %17 : vector<16x16xf32>
    %19 = arith.maximumf %14, %17 : vector<16x16xf32>
    %c3_i32 = arith.constant 3 : i32
    %c0_14 = arith.constant 0 : index
    %20 = arith.index_cast %c3_i32 : i32 to index
    %c0_15 = arith.constant 0 : index
    %c0_16 = arith.constant 0 : index
    %21 = vector.load %arg2[%c0_14, %20, %c0_15, %c0_16] : memref<1x4x16x16xf32, #tpu.memory_space<vmem>>, vector<1x1x16x16xf32>
    %22 = vector.shape_cast %21 : vector<1x1x16x16xf32> to vector<16x16xf32>
    %23 = arith.addf %18, %22 : vector<16x16xf32>
    %24 = arith.maximumf %19, %22 : vector<16x16xf32>
    %c4_i32 = arith.constant 4 : i32
    %c0_17 = arith.constant 0 : index
    %c0_18 = arith.constant 0 : index
    %25 = vector.load %arg7[%c0_17, %c0_18] : memref<16x16xf32, #tpu.memory_space<vmem>>, vector<16x16xf32>
    tpu.vector_store %arg7[%c0_17, %c0_18], %23 {strides = array<i32>} : memref<16x16xf32, #tpu.memory_space<vmem>>, vector<16x16xf32>,
    %c0_19 = arith.constant 0 : index
    %c0_20 = arith.constant 0 : index
    %26 = vector.load %arg8[%c0_19, %c0_20] : memref<16x16xf32, #tpu.memory_space<vmem>>, vector<16x16xf32>
    tpu.vector_store %arg8[%c0_19, %c0_20], %24 {strides = array<i32>} : memref<16x16xf32, #tpu.memory_space<vmem>>, vector<16x16xf32>,
    %c0_i32_21 = arith.constant 0 : i32
    %27 = arith.cmpi eq, %arg1, %c0_i32_21 : i32
    %28 = arith.extui %27 : i1 to i32
    %c0_i32_22 = arith.constant 0 : i32
    %29 = arith.cmpi ne, %28, %c0_i32_22 : i32
    scf.if %29 {
      %c0_23 = arith.constant 0 : index
      %c0_24 = arith.constant 0 : index
      %30 = vector.load %arg7[%c0_23, %c0_24] : memref<16x16xf32, #tpu.memory_space<vmem>>, vector<16x16xf32>
      %cst = arith.constant 2.500000e-01 : f32
      %31 = vector.broadcast %cst : f32 to vector<16x16xf32>
      %32 = arith.mulf %30, %31 : vector<16x16xf32>
      %c0_25 = arith.constant 0 : index
      %c0_26 = arith.constant 0 : index
      %33 = vector.load %arg8[%c0_25, %c0_26] : memref<16x16xf32, #tpu.memory_space<vmem>>, vector<16x16xf32>
      %cst_27 = arith.constant 0.000000e+00 : f32
      %34 = vector.broadcast %cst_27 : f32 to vector<16x16xf32>
      %c0_28 = arith.constant 0 : index
      %c0_29 = arith.constant 0 : index
      %c0_30 = arith.constant 0 : index
      %35 = vector.load %arg3[%c0_28, %c0_29, %c0_30] : memref<7x16x16xf32, #tpu.memory_space<vmem>>, vector<1x16x16xf32>
      %36 = vector.shape_cast %35 : vector<1x16x16xf32> to vector<16x16xf32>
      %cst_31 = arith.constant dense<0.000000e+00> : vector<16x16xf32>
      %37 = tpu.matmul %32, %36, %cst_31 {dimension_numbers = #tpu.dot_dimension_numbers<[1], [0], [0], [1], [0, 0, 1, 1], [], []>} : vector<16x16xf32>, vector<16x16xf32>, vector<16x16xf32> -> vector<16x16xf32>
      %c0_32 = arith.constant 0 : index
      %c0_33 = arith.constant 0 : index
      %c0_34 = arith.constant 0 : index
      %38 = vector.load %arg4[%c0_32, %c0_33, %c0_34] : memref<7x16x16xf32, #tpu.memory_space<vmem>>, vector<1x16x16xf32>
      %39 = vector.shape_cast %38 : vector<1x16x16xf32> to vector<16x16xf32>
      %cst_35 = arith.constant dense<0.000000e+00> : vector<16x16xf32>
      %40 = tpu.matmul %33, %39, %cst_35 {dimension_numbers = #tpu.dot_dimension_numbers<[1], [0], [0], [1], [0, 0, 1, 1], [], []>} : vector<16x16xf32>, vector<16x16xf32>, vector<16x16xf32> -> vector<16x16xf32>
      %41 = arith.addf %37, %40 : vector<16x16xf32>
      %c0_36 = arith.constant 0 : index
      %c0_37 = arith.constant 0 : index
      %c0_38 = arith.constant 0 : index
      %42 = vector.load %arg5[%c0_36, %c0_37, %c0_38] : memref<7x16x16xf32, #tpu.memory_space<vmem>>, vector<1x16x16xf32>
      %43 = vector.shape_cast %42 : vector<1x16x16xf32> to vector<16x16xf32>
      %cst_39 = arith.constant dense<0.000000e+00> : vector<16x16xf32>
      %44 = tpu.matmul %43, %41, %cst_39 {dimension_numbers = #tpu.dot_dimension_numbers<[1], [0], [0], [1], [0, 0, 1, 1], [], []>} : vector<16x16xf32>, vector<16x16xf32>, vector<16x16xf32> -> vector<16x16xf32>
      %45 = arith.addf %34, %44 : vector<16x16xf32>
      %c1 = arith.constant 1 : index
      %c0_40 = arith.constant 0 : index
      %c0_41 = arith.constant 0 : index
      %46 = vector.load %arg3[%c1, %c0_40, %c0_41] : memref<7x16x16xf32, #tpu.memory_space<vmem>>, vector<1x16x16xf32>
      %47 = vector.shape_cast %46 : vector<1x16x16xf32> to vector<16x16xf32>
      %cst_42 = arith.constant dense<0.000000e+00> : vector<16x16xf32>
      %48 = tpu.matmul %32, %47, %cst_42 {dimension_numbers = #tpu.dot_dimension_numbers<[1], [0], [0], [1], [0, 0, 1, 1], [], []>} : vector<16x16xf32>, vector<16x16xf32>, vector<16x16xf32> -> vector<16x16xf32>
      %c1_43 = arith.constant 1 : index
      %c0_44 = arith.constant 0 : index
      %c0_45 = arith.constant 0 : index
      %49 = vector.load %arg4[%c1_43, %c0_44, %c0_45] : memref<7x16x16xf32, #tpu.memory_space<vmem>>, vector<1x16x16xf32>
      %50 = vector.shape_cast %49 : vector<1x16x16xf32> to vector<16x16xf32>
      %cst_46 = arith.constant dense<0.000000e+00> : vector<16x16xf32>
      %51 = tpu.matmul %33, %50, %cst_46 {dimension_numbers = #tpu.dot_dimension_numbers<[1], [0], [0], [1], [0, 0, 1, 1], [], []>} : vector<16x16xf32>, vector<16x16xf32>, vector<16x16xf32> -> vector<16x16xf32>
      %52 = arith.addf %48, %51 : vector<16x16xf32>
      %c1_47 = arith.constant 1 : index
      %c0_48 = arith.constant 0 : index
      %c0_49 = arith.constant 0 : index
      %53 = vector.load %arg5[%c1_47, %c0_48, %c0_49] : memref<7x16x16xf32, #tpu.memory_space<vmem>>, vector<1x16x16xf32>
      %54 = vector.shape_cast %53 : vector<1x16x16xf32> to vector<16x16xf32>
      %cst_50 = arith.constant dense<0.000000e+00> : vector<16x16xf32>
      %55 = tpu.matmul %54, %52, %cst_50 {dimension_numbers = #tpu.dot_dimension_numbers<[1], [0], [0], [1], [0, 0, 1, 1], [], []>} : vector<16x16xf32>, vector<16x16xf32>, vector<16x16xf32> -> vector<16x16xf32>
      %56 = arith.addf %45, %55 : vector<16x16xf32>
      %c2 = arith.constant 2 : index
      %c0_51 = arith.constant 0 : index
      %c0_52 = arith.constant 0 : index
      %57 = vector.load %arg3[%c2, %c0_51, %c0_52] : memref<7x16x16xf32, #tpu.memory_space<vmem>>, vector<1x16x16xf32>
      %58 = vector.shape_cast %57 : vector<1x16x16xf32> to vector<16x16xf32>
      %cst_53 = arith.constant dense<0.000000e+00> : vector<16x16xf32>
      %59 = tpu.matmul %32, %58, %cst_53 {dimension_numbers = #tpu.dot_dimension_numbers<[1], [0], [0], [1], [0, 0, 1, 1], [], []>} : vector<16x16xf32>, vector<16x16xf32>, vector<16x16xf32> -> vector<16x16xf32>
      %c2_54 = arith.constant 2 : index
      %c0_55 = arith.constant 0 : index
      %c0_56 = arith.constant 0 : index
      %60 = vector.load %arg4[%c2_54, %c0_55, %c0_56] : memref<7x16x16xf32, #tpu.memory_space<vmem>>, vector<1x16x16xf32>
      %61 = vector.shape_cast %60 : vector<1x16x16xf32> to vector<16x16xf32>
      %cst_57 = arith.constant dense<0.000000e+00> : vector<16x16xf32>
      %62 = tpu.matmul %33, %61, %cst_57 {dimension_numbers = #tpu.dot_dimension_numbers<[1], [0], [0], [1], [0, 0, 1, 1], [], []>} : vector<16x16xf32>, vector<16x16xf32>, vector<16x16xf32> -> vector<16x16xf32>
      %63 = arith.addf %59, %62 : vector<16x16xf32>
      %c2_58 = arith.constant 2 : index
      %c0_59 = arith.constant 0 : index
      %c0_60 = arith.constant 0 : index
      %64 = vector.load %arg5[%c2_58, %c0_59, %c0_60] : memref<7x16x16xf32, #tpu.memory_space<vmem>>, vector<1x16x16xf32>
      %65 = vector.shape_cast %64 : vector<1x16x16xf32> to vector<16x16xf32>
      %cst_61 = arith.constant dense<0.000000e+00> : vector<16x16xf32>
      %66 = tpu.matmul %65, %63, %cst_61 {dimension_numbers = #tpu.dot_dimension_numbers<[1], [0], [0], [1], [0, 0, 1, 1], [], []>} : vector<16x16xf32>, vector<16x16xf32>, vector<16x16xf32> -> vector<16x16xf32>
      %67 = arith.addf %56, %66 : vector<16x16xf32>
      %c3 = arith.constant 3 : index
      %c0_62 = arith.constant 0 : index
      %c0_63 = arith.constant 0 : index
      %68 = vector.load %arg3[%c3, %c0_62, %c0_63] : memref<7x16x16xf32, #tpu.memory_space<vmem>>, vector<1x16x16xf32>
      %69 = vector.shape_cast %68 : vector<1x16x16xf32> to vector<16x16xf32>
      %cst_64 = arith.constant dense<0.000000e+00> : vector<16x16xf32>
      %70 = tpu.matmul %32, %69, %cst_64 {dimension_numbers = #tpu.dot_dimension_numbers<[1], [0], [0], [1], [0, 0, 1, 1], [], []>} : vector<16x16xf32>, vector<16x16xf32>, vector<16x16xf32> -> vector<16x16xf32>
      %c3_65 = arith.constant 3 : index
      %c0_66 = arith.constant 0 : index
      %c0_67 = arith.constant 0 : index
      %71 = vector.load %arg4[%c3_65, %c0_66, %c0_67] : memref<7x16x16xf32, #tpu.memory_space<vmem>>, vector<1x16x16xf32>
      %72 = vector.shape_cast %71 : vector<1x16x16xf32> to vector<16x16xf32>
      %cst_68 = arith.constant dense<0.000000e+00> : vector<16x16xf32>
      %73 = tpu.matmul %33, %72, %cst_68 {dimension_numbers = #tpu.dot_dimension_numbers<[1], [0], [0], [1], [0, 0, 1, 1], [], []>} : vector<16x16xf32>, vector<16x16xf32>, vector<16x16xf32> -> vector<16x16xf32>
      %74 = arith.addf %70, %73 : vector<16x16xf32>
      %c3_69 = arith.constant 3 : index
      %c0_70 = arith.constant 0 : index
      %c0_71 = arith.constant 0 : index
      %75 = vector.load %arg5[%c3_69, %c0_70, %c0_71] : memref<7x16x16xf32, #tpu.memory_space<vmem>>, vector<1x16x16xf32>
      %76 = vector.shape_cast %75 : vector<1x16x16xf32> to vector<16x16xf32>
      %cst_72 = arith.constant dense<0.000000e+00> : vector<16x16xf32>
      %77 = tpu.matmul %76, %74, %cst_72 {dimension_numbers = #tpu.dot_dimension_numbers<[1], [0], [0], [1], [0, 0, 1, 1], [], []>} : vector<16x16xf32>, vector<16x16xf32>, vector<16x16xf32> -> vector<16x16xf32>
      %78 = arith.addf %67, %77 : vector<16x16xf32>
      %c4 = arith.constant 4 : index
      %c0_73 = arith.constant 0 : index
      %c0_74 = arith.constant 0 : index
      %79 = vector.load %arg3[%c4, %c0_73, %c0_74] : memref<7x16x16xf32, #tpu.memory_space<vmem>>, vector<1x16x16xf32>
      %80 = vector.shape_cast %79 : vector<1x16x16xf32> to vector<16x16xf32>
      %cst_75 = arith.constant dense<0.000000e+00> : vector<16x16xf32>
      %81 = tpu.matmul %32, %80, %cst_75 {dimension_numbers = #tpu.dot_dimension_numbers<[1], [0], [0], [1], [0, 0, 1, 1], [], []>} : vector<16x16xf32>, vector<16x16xf32>, vector<16x16xf32> -> vector<16x16xf32>
      %c4_76 = arith.constant 4 : index
      %c0_77 = arith.constant 0 : index
      %c0_78 = arith.constant 0 : index
      %82 = vector.load %arg4[%c4_76, %c0_77, %c0_78] : memref<7x16x16xf32, #tpu.memory_space<vmem>>, vector<1x16x16xf32>
      %83 = vector.shape_cast %82 : vector<1x16x16xf32> to vector<16x16xf32>
      %cst_79 = arith.constant dense<0.000000e+00> : vector<16x16xf32>
      %84 = tpu.matmul %33, %83, %cst_79 {dimension_numbers = #tpu.dot_dimension_numbers<[1], [0], [0], [1], [0, 0, 1, 1], [], []>} : vector<16x16xf32>, vector<16x16xf32>, vector<16x16xf32> -> vector<16x16xf32>
      %85 = arith.addf %81, %84 : vector<16x16xf32>
      %c4_80 = arith.constant 4 : index
      %c0_81 = arith.constant 0 : index
      %c0_82 = arith.constant 0 : index
      %86 = vector.load %arg5[%c4_80, %c0_81, %c0_82] : memref<7x16x16xf32, #tpu.memory_space<vmem>>, vector<1x16x16xf32>
      %87 = vector.shape_cast %86 : vector<1x16x16xf32> to vector<16x16xf32>
      %cst_83 = arith.constant dense<0.000000e+00> : vector<16x16xf32>
      %88 = tpu.matmul %87, %85, %cst_83 {dimension_numbers = #tpu.dot_dimension_numbers<[1], [0], [0], [1], [0, 0, 1, 1], [], []>} : vector<16x16xf32>, vector<16x16xf32>, vector<16x16xf32> -> vector<16x16xf32>
      %89 = arith.addf %78, %88 : vector<16x16xf32>
      %c5 = arith.constant 5 : index
      %c0_84 = arith.constant 0 : index
      %c0_85 = arith.constant 0 : index
      %90 = vector.load %arg3[%c5, %c0_84, %c0_85] : memref<7x16x16xf32, #tpu.memory_space<vmem>>, vector<1x16x16xf32>
      %91 = vector.shape_cast %90 : vector<1x16x16xf32> to vector<16x16xf32>
      %cst_86 = arith.constant dense<0.000000e+00> : vector<16x16xf32>
      %92 = tpu.matmul %32, %91, %cst_86 {dimension_numbers = #tpu.dot_dimension_numbers<[1], [0], [0], [1], [0, 0, 1, 1], [], []>} : vector<16x16xf32>, vector<16x16xf32>, vector<16x16xf32> -> vector<16x16xf32>
      %c5_87 = arith.constant 5 : index
      %c0_88 = arith.constant 0 : index
      %c0_89 = arith.constant 0 : index
      %93 = vector.load %arg4[%c5_87, %c0_88, %c0_89] : memref<7x16x16xf32, #tpu.memory_space<vmem>>, vector<1x16x16xf32>
      %94 = vector.shape_cast %93 : vector<1x16x16xf32> to vector<16x16xf32>
      %cst_90 = arith.constant dense<0.000000e+00> : vector<16x16xf32>
      %95 = tpu.matmul %33, %94, %cst_90 {dimension_numbers = #tpu.dot_dimension_numbers<[1], [0], [0], [1], [0, 0, 1, 1], [], []>} : vector<16x16xf32>, vector<16x16xf32>, vector<16x16xf32> -> vector<16x16xf32>
      %96 = arith.addf %92, %95 : vector<16x16xf32>
      %c5_91 = arith.constant 5 : index
      %c0_92 = arith.constant 0 : index
      %c0_93 = arith.constant 0 : index
      %97 = vector.load %arg5[%c5_91, %c0_92, %c0_93] : memref<7x16x16xf32, #tpu.memory_space<vmem>>, vector<1x16x16xf32>
      %98 = vector.shape_cast %97 : vector<1x16x16xf32> to vector<16x16xf32>
      %cst_94 = arith.constant dense<0.000000e+00> : vector<16x16xf32>
      %99 = tpu.matmul %98, %96, %cst_94 {dimension_numbers = #tpu.dot_dimension_numbers<[1], [0], [0], [1], [0, 0, 1, 1], [], []>} : vector<16x16xf32>, vector<16x16xf32>, vector<16x16xf32> -> vector<16x16xf32>
      %100 = arith.addf %89, %99 : vector<16x16xf32>
      %c6 = arith.constant 6 : index
      %c0_95 = arith.constant 0 : index
      %c0_96 = arith.constant 0 : index
      %101 = vector.load %arg3[%c6, %c0_95, %c0_96] : memref<7x16x16xf32, #tpu.memory_space<vmem>>, vector<1x16x16xf32>
      %102 = vector.shape_cast %101 : vector<1x16x16xf32> to vector<16x16xf32>
      %cst_97 = arith.constant dense<0.000000e+00> : vector<16x16xf32>
      %103 = tpu.matmul %32, %102, %cst_97 {dimension_numbers = #tpu.dot_dimension_numbers<[1], [0], [0], [1], [0, 0, 1, 1], [], []>} : vector<16x16xf32>, vector<16x16xf32>, vector<16x16xf32> -> vector<16x16xf32>
      %c6_98 = arith.constant 6 : index
      %c0_99 = arith.constant 0 : index
      %c0_100 = arith.constant 0 : index
      %104 = vector.load %arg4[%c6_98, %c0_99, %c0_100] : memref<7x16x16xf32, #tpu.memory_space<vmem>>, vector<1x16x16xf32>
      %105 = vector.shape_cast %104 : vector<1x16x16xf32> to vector<16x16xf32>
      %cst_101 = arith.constant dense<0.000000e+00> : vector<16x16xf32>
      %106 = tpu.matmul %33, %105, %cst_101 {dimension_numbers = #tpu.dot_dimension_numbers<[1], [0], [0], [1], [0, 0, 1, 1], [], []>} : vector<16x16xf32>, vector<16x16xf32>, vector<16x16xf32> -> vector<16x16xf32>
      %107 = arith.addf %103, %106 : vector<16x16xf32>
      %c6_102 = arith.constant 6 : index
      %c0_103 = arith.constant 0 : index
      %c0_104 = arith.constant 0 : index
      %108 = vector.load %arg5[%c6_102, %c0_103, %c0_104] : memref<7x16x16xf32, #tpu.memory_space<vmem>>, vector<1x16x16xf32>
      %109 = vector.shape_cast %108 : vector<1x16x16xf32> to vector<16x16xf32>
      %cst_105 = arith.constant dense<0.000000e+00> : vector<16x16xf32>
      %110 = tpu.matmul %109, %107, %cst_105 {dimension_numbers = #tpu.dot_dimension_numbers<[1], [0], [0], [1], [0, 0, 1, 1], [], []>} : vector<16x16xf32>, vector<16x16xf32>, vector<16x16xf32> -> vector<16x16xf32>
      %111 = arith.addf %100, %110 : vector<16x16xf32>
      %112 = arith.negf %111 : vector<16x16xf32>
      %113 = math.exp %112 : vector<16x16xf32>
      %cst_106 = arith.constant 1.000000e+00 : f32
      %114 = vector.broadcast %cst_106 : f32 to vector<16x16xf32>
      %115 = arith.addf %114, %113 : vector<16x16xf32>
      %116 = arith.divf %114, %115 : vector<16x16xf32>
      %c0_107 = arith.constant 0 : index
      %c0_108 = arith.constant 0 : index
      %c0_109 = arith.constant 0 : index
      %117 = vector.load %arg6[%c0_107, %c0_108, %c0_109] : memref<1x16x16xf32, #tpu.memory_space<vmem>>, vector<1x16x16xf32>
      %118 = vector.shape_cast %117 : vector<1x16x16xf32> to vector<16x16xf32>
      %119 = vector.shape_cast %116 : vector<16x16xf32> to vector<1x16x16xf32>
      tpu.vector_store %arg6[%c0_107, %c0_108, %c0_109], %119 {strides = array<i32>} : memref<1x16x16xf32, #tpu.memory_space<vmem>>, vector<1x16x16xf32>,
    } else {
    }
    return
  }
  func.func @transform_0(%arg0: i32, %arg1: i32) -> (i32, i32, i32, i32) {
    %c0_i32 = arith.constant 0 : i32
    %c0_i32_0 = arith.constant 0 : i32
    %c0_i32_1 = arith.constant 0 : i32
    return %arg0, %arg1, %c0_i32, %c0_i32_0 : i32, i32, i32, i32
  }
  func.func @transform_1(%arg0: i32, %arg1: i32) -> (i32, i32, i32) {
    %c0_i32 = arith.constant 0 : i32
    %c0_i32_0 = arith.constant 0 : i32
    %c0_i32_1 = arith.constant 0 : i32
    %c0_i32_2 = arith.constant 0 : i32
    return %c0_i32, %c0_i32_0, %c0_i32_1 : i32, i32, i32
  }
  func.func @transform_2(%arg0: i32, %arg1: i32) -> (i32, i32, i32) {
    %c0_i32 = arith.constant 0 : i32
    %c0_i32_0 = arith.constant 0 : i32
    %c0_i32_1 = arith.constant 0 : i32
    %c0_i32_2 = arith.constant 0 : i32
    return %c0_i32, %c0_i32_0, %c0_i32_1 : i32, i32, i32
  }
  func.func @transform_3(%arg0: i32, %arg1: i32) -> (i32, i32, i32) {
    %c0_i32 = arith.constant 0 : i32
    %c0_i32_0 = arith.constant 0 : i32
    %c0_i32_1 = arith.constant 0 : i32
    %c0_i32_2 = arith.constant 0 : i32
    return %c0_i32, %c0_i32_0, %c0_i32_1 : i32, i32, i32
  }
  func.func @transform_4(%arg0: i32, %arg1: i32) -> (i32, i32, i32) {
    %c0_i32 = arith.constant 0 : i32
    %c0_i32_0 = arith.constant 0 : i32
    %c0_i32_1 = arith.constant 0 : i32
    return %arg0, %c0_i32, %c0_i32_0 : i32, i32, i32
  }
}

</mosaic_0001>

<bundles_post_ra>
// kernel: tpu_custom_call.1
= control target key start
LH: loop header
LB: loop body
LE: loop exit
PB: predicated region body
PF: predicated region fallthrough
CT: control target
= control target key end

     0   :  { %9 = vsyncpa [#allocation5], 0  ;;  %s3326_s0 = inlined_call_operand.hbm [shape: f32[2,4,16,16], index: 0, kind: input, shape index: {}]   ;;  %s3327_s1 = inlined_call_operand.hbm [shape: f32[7,16,16], index: 1, kind: input, shape index: {}]   ;;  %s3328_s2 = inlined_call_operand.hbm [shape: f32[7,16,16], index: 2, kind: input, shape index: {}]   ;;  %s3329_s3 = inlined_call_operand.hbm [shape: f32[7,16,16], index: 3, kind: input, shape index: {}]   ;;  %s3330_s4 = inlined_call_operand.hbm [shape: f32[2,16,16], index: 4, kind: output, shape index: {}]  }
   0x1   :  { %11 = vsyncpa [#allocation5 + $0x1], 0 }
   0x2   :  { %12 = vsyncpa [#allocation8], 0 }
   0x3   :  { %13 = vsyncpa [#allocation11], 0 }
   0x4   :  { %14 = vsyncpa [#allocation6], 0 }
   0x5   :  { %16 = vsyncpa [#allocation6 + $0x1], 0  ;;  %s2935_s15 = smov 0   ;;  %s2937_s16 = smov 0  }
   0x6   :  { %s2939_s17 = smov 0   ;;  %s2941_s18 = smov 0  }
   0x7   :  { %s2943_s19 = smov 0   ;;  %s2945_s20 = smov 0  }
   0x8 LB: > { %s2172_s21 = sadd.s32 4294967295, %s2897_s20   ;;  %s2173_s22 = sadd.s32 4294967294, %s2897_s20   ;;  %s2897_s20 = sphi %s2945_s20, %s22_s20   ;;  %s2893_s19 = sphi %s2943_s19, %s3357_s19   ;;  %s2889_s18 = sphi %s2941_s18, %s3356_s18   ;;  %s2885_s17 = sphi %s2939_s17, %s3355_s17   ;;  %s2881_s16 = sphi %s2937_s16, %s3354_s16   ;;  %s2877_s15 = sphi %s2935_s15, %s3353_s15  }
   0x9   : > { %p56_p0 = scmp.ne.s32.totalorder %s2881_s16, %s2877_s15  ;;  %p2969_p1 = scmp.eq.s32.totalorder %s2172_s21, 0 }
   0xa   : > { %p2973_p2 = scmp.eq.s32.totalorder %s2172_s21, 1  ;;  %p149_p3 = scmp.eq.s32.totalorder %s2173_s22, 1 }
   0xb   : > { %s3336_s23 = scalar_select %p2969_p1, 1, 0 }
   0xc   : > { %s3337_s24 = scalar_select %p2973_p2, 1, 0 }
   0xd   : > { %p2979_p4 = por %p2969_p1, %p56_p0  ;;  %p2174_p5 = scmp.ge.s32.totalorder %s2897_s20, 1 }
   0xe   : > { %p2984_p6 = por %p149_p3, %p56_p0  ;;  %p156_p7 = scmp.lt.s32.totalorder %s2897_s20, 3 }
   0xf   : > { %s3338_s25 = scalar_select %p2979_p4, 1, 0 }
  0x10   : > { %s3339_s26 = scalar_select %p2984_p6, 1, 0 }
  0x11   : > { %p2989_p8 = pnand %p2174_p5, %p156_p7  ;;  %s2899_s28 = smov [#allocation7]  }
  0x12   : > { %3340 = sst [smem:[#allocation17_spill]] %s3339_s26  ;;  %s168_s29 = sshll.u32 %s2899_s28, 4  ;;  %s2993_s29 = int_to_ptr.vmem [resolvable:$true] %s168_s29 }
  0x13   : > { %s3341_s27 = scalar_select %p2989_p8, 1, 0 }
  0x14   : > { %p2602_p9 = pneg %p2989_p8  ;;  %s2900_s5 = smov [#allocation9]  }
  0x15   : > { %s181_s6 = sshll.u32 %s2900_s5, 4  ;;  %s2901_s7 = smov [#allocation10]   ;;  %s3004_s6 = int_to_ptr.vmem [resolvable:$true] %s181_s6 }
  0x16   : > { %p3000_p11 = pnand %p2602_p9, %p2969_p1  ;;  %s3006_s8 = sshll.u32 %s2901_s7, 4  ;;  %s195_s8 = int_to_ptr.vmem [resolvable:$true] %s3006_s8 }
  0x17   : > { %s2693_s11 = scalar_lea.hbm %s3327_s1, 1792 }
  0x18   : > { %p2694_p12 = scmp.ne.s32.totalorder %s3327_s1, %s2693_s11  ;;  %p3016_p13 = pneg %p3000_p11 }
  0x19   : > { %p2700_p5 = scmp.lt.u32.totalorder %s2693_s11, %s3327_s1 }
  0x1a   : > { %p2696_p0 = pnand %p3016_p13, %p2694_p12 }
  0x1c   : > { %p2697_p3 = pneg %p2696_p0 }
  0x1e   : > { %p2702_p7 = pnand %p2700_p5, %p2697_p3 }
  0x20   : > { %2705 = shalt.err (!%p2702_p7)
}
  0x21   : > { %s2706_s28 = scalar_lea.vmem %s2993_s29, 1792  ;;  %p2714_p1 = scmp.lt.s32.totalorder %s2993_s29, %s2993_s29 }
  0x22   : > { %p2707_p9 = scmp.ne.s32.totalorder %s2993_s29, %s2706_s28  ;;  %p2715_p4 = scmp.lt.s32.totalorder %s2706_s28, %s2706_s28 }
  0x24   : > { %p2709_p10 = pnand %p2707_p9, %p3016_p13  ;;  %p2716_p12 = por %p2715_p4, %p2714_p1 }
  0x26   : > { %p2710_p6 = pneg %p2709_p10 }
  0x28   : > { %p2717_p0 = pnand %p2716_p12, %p2710_p6 }
  0x2a   : > { %2720 = shalt.err (!%p2717_p0)
}
  0x2b   : > { %s2902_s5 = smov 128   ;;  %s2903_s7 = smov 8  }
  0x2c   : > { %2605 = dma.hbm_to_vmem [thread:$0]  (!%p3000_p11), %s3327_s1, 1792, %s2993_s29, [#allocation8], %s2902_s5, %s2902_s5, %s2903_s7  }
  0x2d   : > { %s2721_s13 = scalar_lea.hbm %s3328_s2, 1792 }
  0x2e   : > { %p2722_p1 = scmp.ne.s32.totalorder %s3328_s2, %s2721_s13  ;;  %p2728_p10 = scmp.lt.u32.totalorder %s2721_s13, %s3328_s2 }
  0x30   : > { %p2724_p4 = pnand %p2722_p1, %p3016_p13 }
  0x32   : > { %p2725_p6 = pneg %p2724_p4 }
  0x34   : > { %p2730_p3 = pnand %p2728_p10, %p2725_p6 }
  0x36   : > { %2733 = shalt.err (!%p2730_p3)
}
  0x37   : > { %s2734_s29 = scalar_lea.vmem %s3004_s6, 1792  ;;  %p2742_p12 = scmp.lt.s32.totalorder %s3004_s6, %s3004_s6 }
  0x38   : > { %p2735_p5 = scmp.ne.s32.totalorder %s3004_s6, %s2734_s29  ;;  %p2743_p0 = scmp.lt.s32.totalorder %s2734_s29, %s2734_s29 }
  0x3a   : > { %p2737_p7 = pnand %p2735_p5, %p3016_p13  ;;  %p2744_p1 = por %p2743_p0, %p2742_p12 }
  0x3c   : > { %p2738_p9 = pneg %p2737_p7 }
  0x3e   : > { %p2745_p4 = pnand %p2744_p1, %p2738_p9 }
  0x40   : > { %2748 = shalt.err (!%p2745_p4)
}
  0x41   : > { %2608 = dma.hbm_to_vmem [thread:$0]  (!%p3000_p11), %s3328_s2, 1792, %s3004_s6, [#allocation8], %s2902_s5, %s2902_s5, %s2903_s7  }
  0x42   : > { %s2749_s12 = scalar_lea.hbm %s3329_s3, 1792 }
  0x43   : > { %p2750_p6 = scmp.ne.s32.totalorder %s3329_s3, %s2749_s12  ;;  %p2756_p5 = scmp.lt.u32.totalorder %s2749_s12, %s3329_s3 }
  0x45   : > { %p2752_p10 = pnand %p2750_p6, %p3016_p13 }
  0x47   : > { %p2753_p3 = pneg %p2752_p10 }
  0x49   : > { %p2758_p7 = pnand %p2756_p5, %p2753_p3 }
  0x4b   : > { %2761 = shalt.err (!%p2758_p7)
}
  0x4c   : > { %s2762_s29 = scalar_lea.vmem %s195_s8, 1792  ;;  %p2770_p1 = scmp.lt.s32.totalorder %s195_s8, %s195_s8 }
  0x4d   : > { %p2763_p9 = scmp.ne.s32.totalorder %s195_s8, %s2762_s29  ;;  %p2771_p4 = scmp.lt.s32.totalorder %s2762_s29, %s2762_s29 }
  0x4f   : > { %p2765_p12 = pnand %p2763_p9, %p3016_p13  ;;  %p2772_p8 = por %p2771_p4, %p2770_p1 }
  0x51   : > { %p2766_p0 = pneg %p2765_p12 }
  0x53   : > { %p2773_p2 = pnand %p2772_p8, %p2766_p0 }
  0x55   : > { %2776 = shalt.err (!%p2773_p2)
}
  0x56   : > { %2611 = dma.hbm_to_vmem [thread:$0]  (!%p3000_p11), %s3329_s3, 1792, %s195_s8, [#allocation11], %s2902_s5, %s2902_s5, %s2903_s7  }
  0x57   : > { %s43_s14 = sadd.s32 1, %s2885_s17  ;;  %s34_s30 = sadd.s32 1, %s2893_s19 }
  0x58   : > { %p50_p2 = scmp.ne.s32.totalorder %s2885_s17, %s2881_s16  ;;  %p36_p8 = scmp.ge.s32.totalorder %s34_s30, 2 }
  0x59   : > { %p51_p13 = scmp.eq.s32.totalorder %s2897_s20, 0  ;;  %p3344_p6 = scmp.ne.s32.totalorder %s3337_s24, 0 }
  0x5a   : > { %p2623_p3 = scmp.lt.s32.totalorder %s2897_s20, 2  ;;  %s3359_s30 = smov (%p36_p8, %s34_s30), 0 }
  0x5b   : > { %p3095_p10 = por %p3344_p6, %p50_p2  ;;  %p52_p5 = por %p51_p13, %p50_p2 }
  0x5c   : > { %s208_s10 = sand.u32 1, %s2885_s17   ;;  %s38_s11 = ssub.s32 %s2893_s19, %s3359_s30 }
  0x5d   : > { %p41_p7 = scmp.eq.s32.totalorder %s38_s11, 0  ;;  %s2179_s8 = sshll.u32 %s208_s10, 6 }
  0x5e   : > { %s2243_s12 = sshll.u32 %s2893_s19, 10  ;;  %s212_s28 = scalar_lea.vmem [#allocation4], %s2179_s8 }
  0x5f   : > { %s3107_s13 = scalar_select %p41_p7, %s2885_s17, %s43_s14  }
  0x60   : > { %s3112_s24 = scalar_lea.hbm %s3326_s0, %s2243_s12  ;;  %s222_s29 = sshll.u32 %s212_s28, 4  ;;  %s3114_s29 = int_to_ptr.vmem [resolvable:$true] %s222_s29 }
  0x61   : > { %p3118_p11 = pnand %p2623_p3, %p52_p5  ;;  %s3122_s26 = scalar_lea.sflag [#allocation5], %s208_s10 }
  0x62   : > { %s2777_s14 = scalar_lea.hbm %s3112_s24, 1024  ;;  %s2782_s12 = scalar_lea.hbm %s3326_s0, 2048 }
  0x63   : > { %p2778_p9 = scmp.ne.s32.totalorder %s3112_s24, %s2777_s14  ;;  %p2779_p12 = pneg %p3118_p11 }
  0x64   : > { %p2783_p4 = scmp.lt.u32.totalorder %s3112_s24, %s3326_s0  ;;  %p2784_p2 = scmp.lt.u32.totalorder %s2782_s12, %s2777_s14 }
  0x65   : > { %p2780_p0 = pnand %p2779_p12, %p2778_p9  ;;  %p2786_p13 = scmp.lt.u32.totalorder %s2777_s14, %s3112_s24 }
  0x66   : > { %p2785_p8 = por %p2784_p2, %p2783_p4 }
  0x67   : > { %p2781_p1 = pneg %p2780_p0 }
  0x68   : > { %p2787_p6 = por %p2786_p13, %p2785_p8 }
  0x6a   : > { %p2788_p3 = pnand %p2787_p6, %p2781_p1 }
  0x6c   : > { %2791 = shalt.err (!%p2788_p3)
}
  0x6d   : > { %s2792_s10 = scalar_lea.vmem %s3114_s29, 1024  ;;  %s2904_s28 = smov [#allocation4]  }
  0x6e   : > { %p2793_p5 = scmp.ne.s32.totalorder %s3114_s29, %s2792_s10  ;;  %s2797_s11 = sshll.u32 %s2904_s28, 4  ;;  %s2798_s11 = int_to_ptr.vmem [resolvable:$false] %s2797_s11 }
  0x6f   : > { %s2799_s8 = scalar_lea.vmem %s2798_s11, 2048  ;;  %p2800_p0 = scmp.lt.s32.totalorder %s3114_s29, %s2798_s11 }
  0x70   : > { %p2795_p7 = pnand %p2793_p5, %p2779_p12  ;;  %p2801_p4 = scmp.lt.s32.totalorder %s2799_s8, %s2792_s10 }
  0x72   : > { %p2796_p9 = pneg %p2795_p7  ;;  %p2802_p2 = por %p2801_p4, %p2800_p0 }
  0x74   : > { %p2803_p8 = pnand %p2802_p2, %p2796_p9 }
  0x76   : > { %2806 = shalt.err (!%p2803_p8)
}
  0x77   : > { %2615 = dma.hbm_to_vmem [thread:$0]  (!%p3118_p11), %s3112_s24, 1024, %s3114_s29, %s3122_s26, %s2902_s5, %s2902_s5, %s2903_s7  }
  0x78   : > { %p3347_p12 = scmp.ne.s32.totalorder %s3341_s27, 0 }
  0x79   : > { %s3156_s14 = sand.u32 (!%p3347_p12), 1, %s2881_s16   ;;  %p3348_p1 = scmp.ne.s32.totalorder (!%p3347_p12), %s3338_s25, 0 }
  0x7a   : > { %234 = sbr.rel (%p3347_p12) target bundleno = 913 (0x391), region = 36  ;;  %s2183_s12 = sshll.u32 (!%p3347_p12), %s3156_s14, 6 }
  0x7b   : > { %s237_s21 = scalar_lea.sflag (!%p3347_p12), [#allocation5], %s3156_s14  ;;  %s3160_s22 = scalar_lea.vmem (!%p3347_p12), [#allocation4], %s2183_s12 }
  0x81   : > { %2860 = dma.done.wait (%p3348_p1), %s237_s21, 1024  }
  0x82   : > { %2862 = vsyncadd (%p3348_p1), %s237_s21, 4294966272  ;;  %p3349_p11 = scmp.ne.s32.totalorder %s3336_s23, 0 }
  0x84   : > { %2864 = dma.done.wait (%p3349_p11), [#allocation8], 3584  }
  0x85   : > { %2866 = vsyncadd (%p3349_p11), [#allocation8], 4294963712 }
  0x86   : > { %2868 = dma.done.wait (%p3349_p11), [#allocation11], 1792  }
  0x87   : > { %2870 = vsyncadd (%p3349_p11), [#allocation11], 4294965504  ;;  %vm282_vm0 = vcmask 130048   ;;  %v2905_v0 = vmov 0.0   ;;  %v2906_v1 = vmov -inf   ;;  %v334_v2 = vld [vmem:[#allocation9] sm:$0xff] }
  0x88   : > { %283 = vst.msk [vmem:[#allocation2] sm:$0xff] %vm282_vm0, %v2905_v0  ;;  %285 = vst.msk [vmem:[#allocation3] sm:$0xff] %vm282_vm0, %v2906_v1  ;;  %v335_v3 = vld [vmem:[#allocation9 + $0x8] sm:$0xff]  ;;  %v504_v4 = vld [vmem:[#allocation9 + $0x10] sm:$0xff]  ;;  %s2187_s23 = sshll.u32 %s3156_s14, 4  ;;  %s2244_s25 = sshll.u32 %s2889_s18, 8 }
  0x89   : > { %284 = vst.msk [vmem:[#allocation2 + $0x8] sm:$0xff] %vm282_vm0, %v2905_v0  ;;  %286 = vst.msk [vmem:[#allocation3 + $0x8] sm:$0xff] %vm282_vm0, %v2906_v1  ;;  %v2476_v5 = vpack.c.bf16 %v335_v3, %v334_v2  ;;  %v505_v6 = vld [vmem:[#allocation9 + $0x18] sm:$0xff]  ;;  %v291_v10 = vld [vmem:[%s3160_s22] sm:$0xff]  ;;  %s276_s27 = scalar_lea.vmem [#allocation12], %s2187_s23  ;;  %s3273_s29 = scalar_lea.hbm %s3330_s4, %s2244_s25 }
  0x8a   : > { %v2484_v9 = vpack.c.bf16 %v505_v6, %v504_v4  ;;  %v2188_v11 = vld [vmem:[%s3160_s22 + $0x10] sm:$0xff]  ;;  %v2190_v16 = vld [vmem:[%s3160_s22 + $0x20] sm:$0xff]  ;;  %v292_v17 = vld [vmem:[%s3160_s22 + $0x8] sm:$0xff]  ;;  %s2059_s5 = sshll.u32 %s276_s27, 4  ;;  %s2046_s6 = scalar_lea.sflag [#allocation6], %s3156_s14  ;;  %s3275_s5 = int_to_ptr.vmem [resolvable:$true] %s2059_s5 }
  0x8b   : > { %2477 = vmatprep.subr.bf16.mxu0 %v2476_v5  ;;  %v2189_v18 = vld [vmem:[%s3160_s22 + $0x18] sm:$0xff]  ;;  %v2192_v21 = vld [vmem:[%s3160_s22 + $0x30] sm:$0xff]  ;;  %v332_v24 = vld [vmem:[#allocation7] sm:$0xff]  ;;  %s2807_s18 = scalar_lea.vmem %s3275_s5, 256  ;;  %s2907_s26 = smov [#allocation12]  }
  0x8c   : > { %2485 = vmatprep.subr.bf16.mxu1 %v2484_v9  ;;  %2479 = vmatpush3.bf16.msra.mxu0 %v2476_v5  ;;  %v333_v25 = vld [vmem:[#allocation7 + $0x8] sm:$0xff]  ;;  %v501_v28 = vld [vmem:[#allocation7 + $0x10] sm:$0xff]  ;;  %v502_v29 = vld [vmem:[#allocation7 + $0x18] sm:$0xff]  ;;  %p2808_p13 = scmp.ne.s32.totalorder %s3275_s5, %s2807_s18  ;;  %s2811_s10 = sshll.u32 %s2907_s26, 4  ;;  %s2812_s10 = int_to_ptr.vmem [resolvable:$false] %s2811_s10 }
  0x8d   : > { %2487 = vmatpush3.bf16.msra.mxu1 %v2484_v9  ;;  %v2191_v26 = vld [vmem:[%s3160_s22 + $0x28] sm:$0xff]  ;;  %v2480_v27 = vpack.c.bf16 %v333_v25, %v332_v24  ;;  %v2193_v34 = vld [vmem:[%s3160_s22 + $0x38] sm:$0xff]  ;;  %v2488_v35 = vpack.c.bf16 %v502_v29, %v501_v28  ;;  %v825_v42 = vld [vmem:[#allocation9 + $0x20] sm:$0xff]  ;;  %s2813_s28 = scalar_lea.vmem %s2812_s10, 512  ;;  %p2814_p5 = scmp.lt.s32.totalorder %s3275_s5, %s2812_s10 }
  0x8e   : > { %v826_v43 = vld [vmem:[#allocation9 + $0x28] sm:$0xff]  ;;  %v822_v50 = vld [vmem:[#allocation7 + $0x20] sm:$0xff]  ;;  %v823_v51 = vld [vmem:[#allocation7 + $0x28] sm:$0xff]  ;;  %p2809_p6 = pnand %p2808_p13, %p3095_p10  ;;  %p2815_p7 = scmp.lt.s32.totalorder %s2813_s28, %s2807_s18 }
  0x8f   : > { %v287_v7 = vld [vmem:[#allocation2] sm:$0xff]  ;;  %v289_v8 = vld [vmem:[#allocation3] sm:$0xff]  ;;  %2481 = vmatprep.subr.bf16.mxu0 %v2480_v27  ;;  %2489 = vmatprep.subr.bf16.mxu1 %v2488_v35  ;;  %v2500_v48 = vpack.c.bf16 %v826_v43, %v825_v42  ;;  %v2504_v53 = vpack.c.bf16 %v823_v51, %v822_v50  ;;  %v1068_v55 = vld [vmem:[#allocation9 + $0x38] sm:$0xff] }
  0x90   : > { %v293_v12 = vadd.f32 %v291_v10, %v287_v7  ;;  %v295_v13 = vmax.f32 %v289_v8, %v291_v10  ;;  %v288_v14 = vld [vmem:[#allocation2 + $0x8] sm:$0xff]  ;;  %v290_v15 = vld [vmem:[#allocation3 + $0x8] sm:$0xff]  ;;  %v1067_v54 = vld [vmem:[#allocation9 + $0x30] sm:$0xff]  ;;  %p2810_p3 = pneg %p2809_p6  ;;  %p2816_p9 = por %p2815_p7, %p2814_p5 }
  0x91   : > { %v294_v22 = vadd.f32 %v292_v17, %v288_v14  ;;  %v296_v23 = vmax.f32 %v290_v15, %v292_v17  ;;  %v2512_v56 = vpack.c.bf16 %v1068_v55, %v1067_v54  ;;  %v1064_v57 = vld [vmem:[#allocation7 + $0x30] sm:$0xff]  ;;  %v1065_v58 = vld [vmem:[#allocation7 + $0x38] sm:$0xff]  ;;  %v1551_v61 = vld [vmem:[#allocation9 + $0x50] sm:$0xff] }
  0x92   : > { %v300_v19 = vadd.f32 %v2188_v11, %v293_v12  ;;  %v302_v20 = vmax.f32 %v295_v13, %v2188_v11  ;;  %v2516_v59 = vpack.c.bf16 %v1065_v58, %v1064_v57  ;;  %v657_v60 = vld [vmem:[#allocation10 + $0x10] sm:$0xff]  ;;  %v1552_v62 = vld [vmem:[#allocation9 + $0x58] sm:$0xff]  ;;  %v1549_v1 = vld [vmem:[#allocation7 + $0x58] sm:$0xff]  ;;  %p2817_p0 = pnand %p2816_p9, %p2810_p3 }
  0x93   : > { %v301_v32 = vadd.f32 %v2189_v18, %v294_v22  ;;  %v303_v33 = vmax.f32 %v296_v23, %v2189_v18  ;;  %v2536_v63 = vpack.c.bf16 %v1552_v62, %v1551_v61  ;;  %v1548_v0 = vld [vmem:[#allocation7 + $0x50] sm:$0xff]  ;;  %v1794_v4 = vld [vmem:[#allocation9 + $0x68] sm:$0xff]  ;;  %v1790_v6 = vld [vmem:[#allocation7 + $0x60] sm:$0xff] }
  0x94   : > { %v307_v30 = vadd.f32 %v2190_v16, %v300_v19  ;;  %v309_v31 = vmax.f32 %v302_v20, %v2190_v16  ;;  %v2540_v2 = vpack.c.bf16 %v1549_v1, %v1548_v0  ;;  %v1793_v3 = vld [vmem:[#allocation9 + $0x60] sm:$0xff]  ;;  %v1791_v7 = vld [vmem:[#allocation7 + $0x68] sm:$0xff]  ;;  %v658_v15 = vld [vmem:[#allocation10 + $0x18] sm:$0xff] }
  0x95   : > { %v308_v38 = vadd.f32 %v2191_v26, %v301_v32  ;;  %v310_v39 = vmax.f32 %v303_v33, %v2191_v26  ;;  %v2548_v5 = vpack.c.bf16 %v1794_v4, %v1793_v3  ;;  %v2552_v8 = vpack.c.bf16 %v1791_v7, %v1790_v6  ;;  %v498_v16 = vld [vmem:[#allocation10] sm:$0xff]  ;;  %v499_v19 = vld [vmem:[#allocation10 + $0x8] sm:$0xff]  ;;  %v1220_v23 = vld [vmem:[#allocation10 + $0x30] sm:$0xff] }
  0x96   : > { %v314_v36 = vadd.f32 %v2192_v21, %v307_v30  ;;  %v316_v37 = vmax.f32 %v309_v31, %v2192_v21  ;;  %v978_v21 = vld [vmem:[#allocation10 + $0x20] sm:$0xff]  ;;  %v979_v22 = vld [vmem:[#allocation10 + $0x28] sm:$0xff]  ;;  %v1309_v24 = vld [vmem:[#allocation9 + $0x40] sm:$0xff] }
  0x97   : > { %v315_v40 = vadd.f32 %v2193_v34, %v308_v38  ;;  %v317_v41 = vmax.f32 %v310_v39, %v2193_v34  ;;  %v1310_v25 = vld [vmem:[#allocation9 + $0x48] sm:$0xff]  ;;  %v1306_v30 = vld [vmem:[#allocation7 + $0x40] sm:$0xff]  ;;  %v1307_v31 = vld [vmem:[#allocation7 + $0x48] sm:$0xff] }
  0x98   : > { %321 = vst.msk [vmem:[#allocation3] sm:$0xff] %vm282_vm0, %v316_v37  ;;  %319 = vst.msk [vmem:[#allocation2] sm:$0xff] %vm282_vm0, %v314_v36  ;;  %v2524_v29 = vpack.c.bf16 %v1310_v25, %v1309_v24  ;;  %v1221_v32 = vld [vmem:[#allocation10 + $0x38] sm:$0xff]  ;;  %v2528_v33 = vpack.c.bf16 %v1307_v31, %v1306_v30  ;;  %v1462_v37 = vld [vmem:[#allocation10 + $0x40] sm:$0xff] }
  0x99   : > { %322 = vst.msk [vmem:[#allocation3 + $0x8] sm:$0xff] %vm282_vm0, %v317_v41  ;;  %320 = vst.msk [vmem:[#allocation2 + $0x8] sm:$0xff] %vm282_vm0, %v315_v40 }
  0x9f   : > { %v3190_v44 = vld [vmem:[#allocation3] sm:$0xff]  ;;  %v326_v45 = vld [vmem:[#allocation2] sm:$0xff] }
  0xa0   : > { %2333 = vmatprep.mubr.msk.f32.mxu0 %vm282_vm0, %v3190_v44  ;;  %2347 = vmatprep.mubr.msk.f32.mxu1 %vm282_vm0, %v3190_v44  ;;  %v3196_v46 = vmul.f32 0.25, %v326_v45  ;;  %v3198_v47 = vld [vmem:[#allocation3 + $0x8] sm:$0xff]  ;;  %v327_v49 = vld [vmem:[#allocation2 + $0x8] sm:$0xff]  ;;  %v1704_v45 = vld [vmem:[#allocation10 + $0x50] sm:$0xff] }
  0xa1   : > { %2334 = vmatmul.mubr.msk.f32.vlgmr.msra.gmra.mrb[0].mxu0 %vm282_vm0, %v3198_v47  ;;  %2348 = vmatmul.mubr.msk.f32.vlgmr.msra.gmra.mrb[0].mxu1 %vm282_vm0, %v3198_v47  ;;  %v3208_v52 = vmul.f32 0.25, %v327_v49 }
  0xa2   : > { %2483 = vmatpush3.bf16.msra.mxu0 %v2480_v27  ;;  %2491 = vmatpush3.bf16.msra.mxu1 %v2488_v35 }
  0xa3   : > { %2340 = vmatprep.mubr.msk.f32.mxu0 %vm282_vm0, %v3196_v46  ;;  %2354 = vmatprep.mubr.msk.f32.mxu1 %vm282_vm0, %v3196_v46 }
  0xa4   : > { %2501 = vmatprep.subr.bf16.mxu1 %v2500_v48 }
  0xa9   : > { %2341 = vmatmul.mubr.msk.f32.vlgmr.msra.gmra.mrb[0].mxu0 %vm282_vm0, %v3208_v52  ;;  %2355 = vmatmul.mubr.msk.f32.vlgmr.msra.gmra.mrb[0].mxu1 %vm282_vm0, %v3208_v52 }
  0xaa   : > { %2503 = vmatpush3.bf16.msra.mxu1 %v2500_v48  ;;  %2375 = vmatprep.mubr.msk.f32.mxu1 %vm282_vm0, %v3190_v44  ;;  %v1947_v48 = vld [vmem:[#allocation10 + $0x68] sm:$0xff] }
  0xab   : > { %2505 = vmatprep.subr.bf16.mxu1 %v2504_v53  ;;  %2361 = vmatprep.mubr.msk.f32.mxu0 %vm282_vm0, %v657_v60 }
  0xad   : > { %2376 = vmatmul.mubr.msk.f32.vlgmr.msra.gmra.mrb[2].mxu1 %vm282_vm0, %v3198_v47 }
  0xae   : > { %2507 = vmatpush3.bf16.msra.mxu1 %v2504_v53  ;;  %2382 = vmatprep.mubr.msk.f32.mxu1 %vm282_vm0, %v3196_v46 }
  0xaf   : > { %2513 = vmatprep.subr.bf16.mxu1 %v2512_v56 }
  0xb5   : > { %2383 = vmatmul.mubr.msk.f32.vlgmr.msra.gmra.mrb[2].mxu1 %vm282_vm0, %v3208_v52 }
  0xb6   : > { %2515 = vmatpush3.bf16.msra.mxu1 %v2512_v56  ;;  %2396 = vmatprep.mubr.msk.f32.mxu1 %vm282_vm0, %v3190_v44 }
  0xb7   : > { %2517 = vmatprep.subr.bf16.mxu1 %v2516_v59 }
  0xb9   : > { %2397 = vmatmul.mubr.msk.f32.vlgmr.msra.gmra.mrb[4].mxu1 %vm282_vm0, %v3198_v47 }
  0xba   : > { %2519 = vmatpush3.bf16.msra.mxu1 %v2516_v59  ;;  %2403 = vmatprep.mubr.msk.f32.mxu1 %vm282_vm0, %v3196_v46 }
  0xbb   : > { %2537 = vmatprep.subr.bf16.mxu1 %v2536_v63 }
  0xc1   : > { %2404 = vmatmul.mubr.msk.f32.vlgmr.msra.gmra.mrb[4].mxu1 %vm282_vm0, %v3208_v52 }
  0xc2   : > { %2438 = vmatprep.mubr.msk.f32.mxu1 %vm282_vm0, %v3190_v44  ;;  %2539 = vmatpush3.bf16.msra.mxu1 %v2536_v63 }
  0xc3   : > { %2541 = vmatprep.subr.bf16.mxu1 %v2540_v2 }
  0xc5   : > { %2439 = vmatmul.mubr.msk.f32.vlgmr.msra.gmra.mrb[6].mxu1 %vm282_vm0, %v3198_v47 }
  0xc6   : > { %2445 = vmatprep.mubr.msk.f32.mxu1 %vm282_vm0, %v3196_v46  ;;  %2543 = vmatpush3.bf16.msra.mxu1 %v2540_v2 }
  0xc7   : > { %2549 = vmatprep.subr.bf16.mxu1 %v2548_v5 }
  0xcd   : > { %2446 = vmatmul.mubr.msk.f32.vlgmr.msra.gmra.mrb[6].mxu1 %vm282_vm0, %v3208_v52 }
  0xce   : > { %2551 = vmatpush3.bf16.msra.mxu1 %v2548_v5  ;;  %2459 = vmatprep.mubr.msk.f32.mxu1 %vm282_vm0, %v3190_v44 }
  0xcf   : > { %2553 = vmatprep.subr.bf16.mxu1 %v2552_v8 }
  0xd1   : > { %2460 = vmatmul.mubr.msk.f32.vlgmr.msra.gmra.mrb[8].mxu1 %vm282_vm0, %v3198_v47 }
  0xd2   : > { %2466 = vmatprep.mubr.msk.f32.mxu1 %vm282_vm0, %v3196_v46  ;;  %2555 = vmatpush3.bf16.msra.mxu1 %v2552_v8 }
  0xd9   : > { %2467 = vmatmul.mubr.msk.f32.vlgmr.msra.gmra.mrb[8].mxu1 %vm282_vm0, %v3208_v52 }
 0x17c   : > { %v2342_v9 = vpop.f32.mrb[0].mxu0  ;;  %v2356_v10 = vpop.f32.mrb[0].mxu1 }
 0x17d   : > { %v489_v11 = vpop.f32.mrb[1].mxu0  ;;  %v647_v12 = vpop.f32.mrb[1].mxu1 }
 0x17e   : > { %v2496_v13 = vpack.c.bf16 %v2342_v9, %v489_v11  ;;  %v2492_v14 = vpack.c.bf16 %v2356_v10, %v647_v12 }
 0x180   : > { %2493 = vmatprep.subr.bf16.mxu0 %v2492_v14 }
 0x181   : > { %2495 = vmatpush3.bf16.msra.mxu0 %v2492_v14 }
 0x182   : > { %2497 = vmatprep.subr.bf16.mxu0 %v2496_v13 }
 0x184   : > { %2362 = vmatmul.mubr.msk.f32.vlgmr.msra.gmra.mrb[2].mxu0 %vm282_vm0, %v658_v15 }
 0x185   : > { %2499 = vmatpush3.bf16.msra.mxu0 %v2496_v13  ;;  %2368 = vmatprep.mubr.msk.f32.mxu0 %vm282_vm0, %v498_v16 }
 0x188   : > { %v2384_v17 = vpop.f32.mrb[2].mxu1 }
 0x189   : > { %v968_v18 = vpop.f32.mrb[3].mxu1 }
 0x18a   : > { %v2508_v20 = vpack.c.bf16 %v2384_v17, %v968_v18 }
 0x18c   : > { %2369 = vmatmul.mubr.msk.f32.vlgmr.msra.gmra.mrb[2].mxu0 %vm282_vm0, %v499_v19  ;;  %2509 = vmatprep.subr.bf16.mxu0 %v2508_v20 }
 0x18d   : > { %2511 = vmatpush3.bf16.msra.mxu0 %v2508_v20  ;;  %2389 = vmatprep.mubr.msk.f32.mxu0 %vm282_vm0, %v978_v21 }
 0x194   : > { %2390 = vmatmul.mubr.msk.f32.vlgmr.msra.gmra.mrb[2].mxu0 %vm282_vm0, %v979_v22  ;;  %v2405_v26 = vpop.f32.mrb[4].mxu1 }
 0x195   : > { %v1210_v27 = vpop.f32.mrb[5].mxu1  ;;  %2410 = vmatprep.mubr.msk.f32.mxu0 %vm282_vm0, %v1220_v23 }
 0x196   : > { %v2520_v28 = vpack.c.bf16 %v2405_v26, %v1210_v27 }
 0x198   : > { %2521 = vmatprep.subr.bf16.mxu0 %v2520_v28 }
 0x199   : > { %2523 = vmatpush3.bf16.msra.mxu0 %v2520_v28 }
 0x19a   : > { %2525 = vmatprep.subr.bf16.mxu0 %v2524_v29 }
 0x19c   : > { %2411 = vmatmul.mubr.msk.f32.vlgmr.msra.gmra.mrb[2].mxu0 %vm282_vm0, %v1221_v32 }
 0x19d   : > { %2527 = vmatpush3.bf16.msra.mxu0 %v2524_v29  ;;  %2417 = vmatprep.mubr.msk.f32.mxu0 %vm282_vm0, %v3190_v44  ;;  %v1463_v44 = vld [vmem:[#allocation10 + $0x48] sm:$0xff] }
 0x19e   : > { %2529 = vmatprep.subr.bf16.mxu0 %v2528_v33 }
 0x1a0   : > { %2418 = vmatmul.mubr.msk.f32.vlgmr.msra.gmra.mrb[4].mxu0 %vm282_vm0, %v3198_v47  ;;  %v2447_v34 = vpop.f32.mrb[6].mxu1  ;;  %v1946_v47 = vld [vmem:[#allocation10 + $0x60] sm:$0xff] }
 0x1a1   : > { %2531 = vmatpush3.bf16.msra.mxu0 %v2528_v33  ;;  %2424 = vmatprep.mubr.msk.f32.mxu0 %vm282_vm0, %v3196_v46  ;;  %v1694_v35 = vpop.f32.mrb[7].mxu1  ;;  %v1705_v46 = vld [vmem:[#allocation10 + $0x58] sm:$0xff] }
 0x1a2   : > { %v2544_v36 = vpack.c.bf16 %v2447_v34, %v1694_v35 }
 0x1a8   : > { %2425 = vmatmul.mubr.msk.f32.vlgmr.msra.gmra.mrb[4].mxu0 %vm282_vm0, %v3208_v52 }
 0x1a9   : > { %2431 = vmatprep.mubr.msk.f32.mxu0 %vm282_vm0, %v1462_v37 }
 0x1ac   : > { %v2468_v38 = vpop.f32.mrb[8].mxu1 }
 0x1ad   : > { %v1936_v39 = vpop.f32.mrb[9].mxu1 }
 0x1ae   : > { %v2556_v40 = vpack.c.bf16 %v2468_v38, %v1936_v39 }
 0x27b   : > { %v2426_v41 = vpop.f32.mrb[4].mxu0 }
 0x27c   : > { %v1452_v42 = vpop.f32.mrb[5].mxu0 }
 0x27d   : > { %v2532_v43 = vpack.c.bf16 %v2426_v41, %v1452_v42 }
 0x27f   : > { %2533 = vmatprep.subr.bf16.mxu0 %v2532_v43 }
 0x280   : > { %2535 = vmatpush3.bf16.msra.mxu0 %v2532_v43 }
 0x281   : > { %2545 = vmatprep.subr.bf16.mxu0 %v2544_v36 }
 0x283   : > { %2432 = vmatmul.mubr.msk.f32.vlgmr.msra.gmra.mrb[2].mxu0 %vm282_vm0, %v1463_v44 }
 0x284   : > { %2547 = vmatpush3.bf16.msra.mxu0 %v2544_v36  ;;  %2452 = vmatprep.mubr.msk.f32.mxu0 %vm282_vm0, %v1704_v45 }
 0x285   : > { %2557 = vmatprep.subr.bf16.mxu0 %v2556_v40 }
 0x28b   : > { %2453 = vmatmul.mubr.msk.f32.vlgmr.msra.gmra.mrb[2].mxu0 %vm282_vm0, %v1705_v46 }
 0x28c   : > { %2559 = vmatpush3.bf16.msra.mxu0 %v2556_v40  ;;  %2473 = vmatprep.mubr.msk.f32.mxu0 %vm282_vm0, %v1946_v47 }
 0x293   : > { %2474 = vmatmul.mubr.msk.f32.vlgmr.msra.gmra.mrb[2].mxu0 %vm282_vm0, %v1947_v48 }
 0x366   : > { %v2475_v49 = vpop.f32.mrb[2].mxu0 }
 0x367   : > { %v2237_v50 = vmul.f32 -1.442695, %v2475_v49  ;;  %v2020_v51 = vpop.f32.mrb[3].mxu0 }
 0x368   : > { %v2236_v52 = vmul.f32 -1.442695, %v2020_v51 }
 0x369   : > { %2685 = vpow2.f32 %v2237_v50 }
 0x36a   : > { %2687 = vpow2.f32 %v2236_v52 }
 0x373   : > { %v2686_v53 = vpop.eup %2685 }
 0x374   : > { %v2688_v54 = vpop.eup %2687  ;;  %v2038_v55 = vadd.f32 1.0, %v2686_v53 }
 0x375   : > { %v2037_v56 = vadd.f32 1.0, %v2688_v54 }
 0x376   : > { %2689 = vrcp.f32 %v2038_v55 }
 0x377   : > { %2691 = vrcp.f32 %v2037_v56 }
 0x380   : > { %v2690_v57 = vpop.eup %2689 }
 0x381   : > { %v2692_v58 = vpop.eup %2691  ;;  %2044 = vst.msk [vmem:[%s276_s27 + $0x8] sm:$0xff] %vm282_vm0, %v2690_v57 }
 0x382   : > { %2043 = vst.msk [vmem:[%s276_s27] sm:$0xff] %vm282_vm0, %v2692_v58 }
 0x383   : > { %2820 = shalt.err (!%p2817_p0)
}
 0x384   : > { %s2821_s11 = scalar_lea.hbm %s3273_s29, 256  ;;  %s2825_s21 = scalar_lea.hbm %s3330_s4, 512 }
 0x385   : > { %p2822_p4 = scmp.ne.s32.totalorder %s3273_s29, %s2821_s11  ;;  %p2826_p12 = scmp.lt.u32.totalorder %s3273_s29, %s3330_s4 }
 0x386   : > { %p2827_p1 = scmp.lt.u32.totalorder %s2825_s21, %s2821_s11  ;;  %p2829_p13 = scmp.lt.u32.totalorder %s2821_s11, %s3273_s29 }
 0x387   : > { %p2823_p2 = pnand %p2822_p4, %p3095_p10 }
 0x388   : > { %p2828_p11 = por %p2827_p1, %p2826_p12 }
 0x389   : > { %p2824_p8 = pneg %p2823_p2 }
 0x38a   : > { %p2830_p6 = por %p2829_p13, %p2828_p11 }
 0x38c   : > { %p2831_p3 = pnand %p2830_p6, %p2824_p8 }
 0x38e   : > { %2834 = shalt.err (!%p2831_p3)
}
 0x38f   : > { %s2908_s25 = smov 128   ;;  %s2909_s27 = smov 8  }
 0x390   : > { %2600 = dma.vmem_to_hbm [thread:$0]  (%p3095_p10), %s3275_s5, 256, %s3273_s29, %s2046_s6, %s2908_s25, %s2908_s25, %s2909_s27  }
 0x391 PF: > { %s3350_s7 = sld [smem:[#allocation17_spill]]  ;;  %s2074_s24 = sand.u32 1, %s2877_s15  }
 0x392   : > { %p3352_p7 = scmp.ge.s32.totalorder %s2897_s20, 2  ;;  %s2075_s18 = scalar_lea.sflag [#allocation6], %s2074_s24 }
 0x397   : > { %p3351_p5 = scmp.ne.s32.totalorder %s3350_s7, 0 }
 0x399   : > { %p2617_p9 = pnand %p3352_p7, %p3351_p5 }
 0x39b   : > { %2872 = dma.done.wait (!%p2617_p9), %s2075_s18, 256  }
 0x39c   : > { %2874 = vsyncadd (!%p2617_p9), %s2075_s18, 4294967040  ;;  %s22_s20 = sadd.s32 1, %s2897_s20   ;;  %s3353_s15 = smov %s2881_s16 }
 0x39d   : > { %p19_p0 = scmp.ge.s32.totalorder %s22_s20, 4   ;;  %s3354_s16 = smov %s2885_s17 }
 0x39e   : > { %s3355_s17 = smov %s3107_s13  ;;  %s3356_s18 = smov %s2893_s19 }
 0x39f   : > { %s3357_s19 = smov %s3359_s30  ;;  %21 = sbr.rel (!%p19_p0) target bundleno = 8 (0x8), region = 122 }
 0x3a6   :  { %2080 = vsyncpa [#allocation5], 1 }
 0x3a7   :  { %2082 = vsyncpa [#allocation5 + $0x1], 1 }
 0x3a8   :  { %2083 = vsyncpa [#allocation8], 1 }
 0x3a9   :  { %2084 = vsyncpa [#allocation11], 1 }
 0x3aa   :  { %2085 = vsyncpa [#allocation6], 1 }
 0x3ab   :  { %2087 = vsyncpa [#allocation6 + $0x1], 1 }

</bundles_post_ra>
